<compile_context>
chip_gen: v5e
topology: v5e:2x2
jax: 0.10.0
libtpu: 0.0.40
codegen_flags: <defaults>
</compile_context>

<pallas_src>
import functools

import jax
import jax.numpy as jnp
from jax.experimental import pallas as pl
from jax.experimental.pallas import tpu as pltpu

_LANE = 128


def _l2norm_residual_kernel(x_ref, w_ref, b_ref, o_ref, *, eps, matmul_dtype):
    # x_ref: (C, tile_hw) activations, spatial on the lane axis
    # w_ref: (C, C)       1x1-conv weight (out_ch, in_ch), possibly bf16
    # b_ref: (C, 1)       bias (broadcasts over lanes), f32
    x = x_ref[...]
    xm = x if x.dtype == matmul_dtype else x.astype(matmul_dtype)
    # fn(x): pointwise conv == W @ x + b (no transpose in this layout);
    # the MXU accumulates in f32 regardless of operand dtype.
    out = jnp.dot(w_ref[...], xm, preferred_element_type=jnp.float32)
    out = out + b_ref[...].astype(jnp.float32)
    # L2-norm residual combine, entirely in f32.
    xf = x.astype(jnp.float32)
    o_ref[...] = jnp.sqrt(0.5 * (xf * xf + out * out) + eps).astype(o_ref.dtype)


def _vmem_budget_bytes():
    """Per-generation VMEM budget (half of physical capacity, capped)."""
    try:
        cap = pltpu.get_tpu_info().vmem_capacity_bytes
    except Exception:
        cap = 64 * 1024 * 1024          # conservative fallback: v7x-sized VMEM
    return int(min(cap // 2, 64 * 1024 * 1024))


def _pick_tile_hw(HW, hw_cap, want_two_steps):
    """Spatial (lane-axis) tile: full HW, or a lane multiple that divides it."""
    if HW <= hw_cap:
        if not want_two_steps or HW < 2 * _LANE:
            return HW                    # whole spatial slab, single block
        # N == 1: split HW so both v7x TensorCores get a 'parallel' step.
        hw_cap = min(hw_cap, max(_LANE, (HW // 2) // _LANE * _LANE))
    top = min(hw_cap, max(_LANE, (HW // _LANE) * _LANE))
    t = top
    while t >= _LANE:                    # prefer exact divisors (no ragged tail)
        if HW % t == 0:
            return t
        t -= _LANE
    return top                           # ragged tail: Pallas masks OOB writes


def l2norm_residual(x_nchw, weight, bias, *, eps=1e-6):
    """out = sqrt(0.5*x^2 + 0.5*(conv1x1(x))^2 + eps), NCHW layout.

    x_nchw: (N, C, H, W); weight: (C, C) = (out_ch, in_ch); bias: (C,).
    """
    N, C, H, W = x_nchw.shape
    assert weight.shape == (C, C) and bias.shape == (C,)
    HW = H * W

    # bf16 MXU operands once the matmul dominates; pure mem-bound below that.
    use_bf16_mxu = C >= 1024
    matmul_dtype = jnp.bfloat16 if use_bf16_mxu else jnp.float32
    w_in = weight if weight.dtype == matmul_dtype else weight.astype(matmul_dtype)
    b_in = bias.astype(jnp.float32).reshape(C, 1)

    in_item = jnp.dtype(x_nchw.dtype).itemsize
    mm_item = jnp.dtype(matmul_dtype).itemsize
    w_item = jnp.dtype(w_in.dtype).itemsize

    # VMEM resident set per lane column of a spatial tile:
    #   2x x-buffer + 2x out-buffer (pipeline double-buffering)
    #   + f32 dot intermediate
    #   + in-kernel casts of x (to matmul dtype and/or f32) when needed.
    per_col = C * (2 * in_item + 2 * in_item + 4
                   + (mm_item if mm_item != in_item else 0)
                   + (4 if in_item < 4 else 0))
    fixed = C * C * w_item + C * 4       # Buffered(1) weight + f32 bias
    budget = _vmem_budget_bytes()
    hw_cap = max(_LANE, ((budget - fixed) // per_col) // _LANE * _LANE)

    tile_hw = _pick_tile_hw(HW, hw_cap, want_two_steps=(N < 2))
    n_hw = pl.cdiv(HW, tile_hw)

    # NCHW is already (N, C, H*W) contiguously: pure reshape, no HBM pass.
    x = x_nchw.reshape(N, C, HW)

    kernel = functools.partial(_l2norm_residual_kernel, eps=eps,
                               matmul_dtype=matmul_dtype)

    y = pl.pallas_call(
        kernel,
        out_shape=jax.ShapeDtypeStruct((N, C, HW), x.dtype),
        grid_spec=pltpu.PrefetchScalarGridSpec(
            num_scalar_prefetch=0,
            grid=(N, n_hw),
            in_specs=[
                # activations: (C, tile_hw) view, batch dim squeezed out
                pl.BlockSpec((pl.Squeezed(), C, tile_hw),
                             lambda n, j: (n, 0, j)),
                # full weight, grid-invariant, single-buffered
                pl.BlockSpec((C, C), lambda n, j: (0, 0),
                             pipeline_mode=pl.Buffered(1)),
                # bias as a (C, 1) column, grid-invariant, single-buffered
                pl.BlockSpec((C, 1), lambda n, j: (0, 0),
                             pipeline_mode=pl.Buffered(1)),
            ],
            out_specs=pl.BlockSpec((pl.Squeezed(), C, tile_hw),
                                   lambda n, j: (n, 0, j)),
        ),
        compiler_params=pltpu.CompilerParams(
            dimension_semantics=("parallel", "parallel"),
            vmem_limit_bytes=budget),
    )(x, w_in, b_in)

    return y.reshape(N, C, H, W)


if __name__ == "__main__":
    key = jax.random.PRNGKey(0)
    kx, kw, kb = jax.random.split(key, 3)

    N, C, H, W = 2, 4, 16, 16
    x = jax.random.normal(kx, (N, C, H, W), dtype=jnp.float32)
    # deterministic "conv1x1" parameters (synthetic init, not a checkpoint)
    weight = jax.random.normal(kw, (C, C), dtype=jnp.float32) * 0.1
    bias = jax.random.normal(kb, (C,), dtype=jnp.float32) * 0.1
    eps = 1e-6

    y = l2norm_residual(x, weight, bias, eps=eps)
    y = jax.block_until_ready(y)

    # pure-JAX reference (same math, NCHW)
    out_ref = jnp.einsum("oc,nchw->nohw", weight, x) + bias[None, :, None, None]
    ref = jnp.sqrt(0.5 * x ** 2 + 0.5 * out_ref ** 2 + eps)
    assert y.shape == (N, C, H, W)
    assert jnp.allclose(y, ref, atol=1e-5, rtol=1e-5)

    print("KERNEL_OK")
</pallas_src>

<mosaic_0001>
module attributes {stable_mosaic.version = 11 : i64} {
  func.func @_l2norm_residual_kernel(%arg0: i32, %arg1: i32, %arg2: memref<1x4x256xf32, #tpu.memory_space<vmem>>, %arg3: memref<4x4xf32, #tpu.memory_space<vmem>>, %arg4: memref<4x1xf32, #tpu.memory_space<vmem>>, %arg5: memref<1x4x256xf32, #tpu.memory_space<vmem>>) attributes {dimension_semantics = [#tpu.dimension_semantics<parallel>, #tpu.dimension_semantics<parallel>], iteration_bounds = array<i64: 2, 1>, scalar_prefetch = 0 : i64, scratch_operands = 0 : i64, tpu.core_type = #tpu.core_type<tc>, window_params = [{transform_indices = @transform_0, window_bounds = array<i64: 1, 4, 256>}, {pipeline_mode = #tpu.pipeline_mode<synchronous>, transform_indices = @transform_1, window_bounds = array<i64: 4, 4>}, {pipeline_mode = #tpu.pipeline_mode<synchronous>, transform_indices = @transform_2, window_bounds = array<i64: 4, 1>}, {transform_indices = @transform_3, window_bounds = array<i64: 1, 4, 256>}]} {
    %c0 = arith.constant 0 : index
    %c0_0 = arith.constant 0 : index
    %c0_1 = arith.constant 0 : index
    %0 = vector.load %arg2[%c0, %c0_0, %c0_1] : memref<1x4x256xf32, #tpu.memory_space<vmem>>, vector<1x4x256xf32>
    %1 = vector.shape_cast %0 : vector<1x4x256xf32> to vector<4x256xf32>
    %c0_2 = arith.constant 0 : index
    %c0_3 = arith.constant 0 : index
    %2 = vector.load %arg3[%c0_2, %c0_3] : memref<4x4xf32, #tpu.memory_space<vmem>>, vector<4x4xf32>
    %cst = arith.constant dense<0.000000e+00> : vector<4x256xf32>
    %3 = tpu.matmul %2, %1, %cst {dimension_numbers = #tpu.dot_dimension_numbers<[1], [0], [0], [1], [0, 0, 1, 1], [], []>} : vector<4x4xf32>, vector<4x256xf32>, vector<4x256xf32> -> vector<4x256xf32>
    %c0_4 = arith.constant 0 : index
    %c0_5 = arith.constant 0 : index
    %4 = vector.load %arg4[%c0_4, %c0_5] : memref<4x1xf32, #tpu.memory_space<vmem>>, vector<4x1xf32>
    %5 = vector.broadcast %4 : vector<4x1xf32> to vector<4x256xf32>
    %6 = arith.addf %3, %5 : vector<4x256xf32>
    %7 = arith.mulf %1, %1 : vector<4x256xf32>
    %8 = arith.mulf %6, %6 : vector<4x256xf32>
    %9 = arith.addf %7, %8 : vector<4x256xf32>
    %cst_6 = arith.constant 5.000000e-01 : f32
    %10 = vector.broadcast %cst_6 : f32 to vector<4x256xf32>
    %11 = arith.mulf %10, %9 : vector<4x256xf32>
    %cst_7 = arith.constant 9.99999997E-7 : f32
    %12 = vector.broadcast %cst_7 : f32 to vector<4x256xf32>
    %13 = arith.addf %11, %12 : vector<4x256xf32>
    %14 = math.sqrt %13 : vector<4x256xf32>
    %c0_8 = arith.constant 0 : index
    %c0_9 = arith.constant 0 : index
    %c0_10 = arith.constant 0 : index
    %15 = vector.load %arg5[%c0_8, %c0_9, %c0_10] : memref<1x4x256xf32, #tpu.memory_space<vmem>>, vector<1x4x256xf32>
    %16 = vector.shape_cast %15 : vector<1x4x256xf32> to vector<4x256xf32>
    %17 = vector.shape_cast %14 : vector<4x256xf32> to vector<1x4x256xf32>
    tpu.vector_store %arg5[%c0_8, %c0_9, %c0_10], %17 {strides = array<i32>} : memref<1x4x256xf32, #tpu.memory_space<vmem>>, vector<1x4x256xf32>,
    return
  }
  func.func @transform_0(%arg0: i32, %arg1: i32) -> (i32, i32, i32) {
    %c0_i32 = arith.constant 0 : i32
    %c0_i32_0 = arith.constant 0 : i32
    return %arg0, %c0_i32, %arg1 : i32, i32, i32
  }
  func.func @transform_1(%arg0: i32, %arg1: i32) -> (i32, i32) {
    %c0_i32 = arith.constant 0 : i32
    %c0_i32_0 = arith.constant 0 : i32
    %c0_i32_1 = arith.constant 0 : i32
    return %c0_i32, %c0_i32_0 : i32, i32
  }
  func.func @transform_2(%arg0: i32, %arg1: i32) -> (i32, i32) {
    %c0_i32 = arith.constant 0 : i32
    %c0_i32_0 = arith.constant 0 : i32
    %c0_i32_1 = arith.constant 0 : i32
    return %c0_i32, %c0_i32_0 : i32, i32
  }
  func.func @transform_3(%arg0: i32, %arg1: i32) -> (i32, i32, i32) {
    %c0_i32 = arith.constant 0 : i32
    %c0_i32_0 = arith.constant 0 : i32
    return %arg0, %c0_i32, %arg1 : i32, i32, i32
  }
}

</mosaic_0001>

<bundles_post_ra>
// kernel: tpu_custom_call.1
= control target key start
LH: loop header
LB: loop body
LE: loop exit
PB: predicated region body
PF: predicated region fallthrough
CT: control target
= control target key end

     0   :  { %8 = vsyncpa [#allocation3], 0  ;;  %s752_s0 = inlined_call_operand.hbm [shape: f32[2,4,256], index: 0, kind: input, shape index: {}]   ;;  %s753_s1 = inlined_call_operand.vmem [shape: f32[4,4], index: 1, kind: input, shape index: {}]   ;;  %s754_s2 = inlined_call_operand.vmem [shape: f32[4,1], index: 2, kind: input, shape index: {}]   ;;  %s755_s3 = inlined_call_operand.hbm [shape: f32[2,4,256], index: 3, kind: output, shape index: {}]  }
   0x1   :  { %10 = vsyncpa [#allocation3 + $0x1], 0 }
   0x2   :  { %11 = vsyncpa [#allocation4], 0 }
   0x3   :  { %13 = vsyncpa [#allocation4 + $0x1], 0  ;;  %s619_s12 = smov 0   ;;  %s621_s13 = smov 0  }
   0x4   :  { %s623_s14 = smov 0   ;;  %s625_s15 = smov 0  }
   0x5   :  { %s627_s16 = smov 0   ;;  %s629_s17 = smov 0  }
   0x6 LB: > { %s397_s18 = sadd.s32 4294967295, %s596_s17   ;;  %s398_s19 = sadd.s32 4294967294, %s596_s17   ;;  %s596_s17 = sphi %s629_s17, %s19_s17   ;;  %s592_s16 = sphi %s627_s16, %s764_s16   ;;  %s588_s15 = sphi %s625_s15, %s763_s15   ;;  %s584_s14 = sphi %s623_s14, %s762_s14   ;;  %s580_s13 = sphi %s621_s13, %s761_s13   ;;  %s576_s12 = sphi %s619_s12, %s760_s12  }
   0x7   : > { %s31_s20 = sadd.s32 1, %s592_s16  ;;  %s40_s21 = sadd.s32 1, %s584_s14 }
   0x8   : > { %p33_p0 = scmp.ge.s32.totalorder %s31_s20, 2  ;;  %p47_p1 = scmp.ne.s32.totalorder %s584_s14, %s580_s13 }
   0x9   : > { %p48_p2 = scmp.eq.s32.totalorder %s596_s17, 0  ;;  %p53_p3 = scmp.ne.s32.totalorder %s580_s13, %s576_s12 }
   0xa   : > { %s766_s20 = smov (%p33_p0, %s31_s20), 0  ;;  %p54_p5 = scmp.eq.s32.totalorder %s397_s18, 0 }
   0xb   : > { %p660_p4 = por %p48_p2, %p47_p1  ;;  %s35_s23 = ssub.s32 %s592_s16, %s766_s20 }
   0xc   : > { %p121_p6 = scmp.eq.s32.totalorder %s397_s18, 1  ;;  %p38_p7 = scmp.eq.s32.totalorder %s35_s23, 0 }
   0xd   : > { %p666_p8 = por %p54_p5, %p53_p3  ;;  %p127_p10 = scmp.eq.s32.totalorder %s398_s19, 1 }
   0xe   : > { %p670_p9 = por %p121_p6, %p47_p1  ;;  %p400_p12 = scmp.ge.s32.totalorder %s596_s17, 2 }
   0xf   : > { %s675_s26 = scalar_select %p38_p7, %s584_s14, %s40_s21  }
  0x10   : > { %p677_p11 = por %p127_p10, %p53_p3  ;;  %p430_p13 = scmp.lt.s32.totalorder %s596_s17, 2 }
  0x11   : > { %s153_s28 = sand.u32 1, %s584_s14   ;;  %s416_s30 = sshll.u32 %s592_s16, 3 }
  0x12   : > { %s401_s29 = sshll.u32 %s153_s28, 3  ;;  %s164_s6 = scalar_lea.hbm %s752_s0, %s416_s30 }
  0x13   : > { %s157_s7 = scalar_lea.vmem [#allocation2], %s401_s29  ;;  %s166_s9 = sshll.u32 %s164_s6, 4  ;;  %s167_s9 = int_to_ptr.hbm [resolvable:$true] %s166_s9 }
  0x14   : > { %s168_s8 = sshll.u32 %s157_s7, 4  ;;  %p423_p0 = pnand %p430_p13, %p660_p4  ;;  %s169_s8 = int_to_ptr.vmem [resolvable:$true] %s168_s8 }
  0x15   : > { %p404_p1 = scmp.ge.s32.totalorder %s596_s17, 1  ;;  %p173_p2 = scmp.lt.s32.totalorder %s596_s17, 3 }
  0x16   : > { %s154_s10 = scalar_lea.sflag [#allocation3], %s153_s28 }
  0x17   : > { %425 = dma.hbm_to_vmem [thread:$0]  (!%p423_p0), %s167_s9, 128, %s169_s8, %s154_s10  }
  0x18   : > { %p174_p3 = pnand %p404_p1, %p173_p2 }
  0x19   : > { %s693_s11 = sand.u32 (!%p174_p3), 1, %s580_s13  }
  0x1a   : > { %177 = sbr.rel (%p174_p3) target bundleno = 205 (0xcd), region = 32  ;;  %s405_s18 = sshll.u32 (!%p174_p3), %s693_s11, 3 }
  0x1b   : > { %s180_s19 = scalar_lea.sflag (!%p174_p3), [#allocation3], %s693_s11  ;;  %s183_s21 = scalar_lea.vmem (!%p174_p3), [#allocation2], %s405_s18 }
  0x1f   : > { %567 = dma.done.wait (%p666_p8), %s180_s19, 128  }
  0x20   : > { %569 = vsyncadd (%p666_p8), %s180_s19, 4294967168  ;;  %v598_v0 = vmov 0   ;;  %v209_v1 = vld [vmem:[%s183_s21] sm:$0xff]  ;;  %v211_v2 = vld [vmem:[%s754_s2] sm:$0xf]  ;;  %vm225_vm0 = vcmask 1043456  }
  0x21   : > { %481 = vset.pattern.permute.xlu0 %v598_v0  ;;  %218 = vst [vmem:[#allocation1] ss:$2 sm:$0xff] %v209_v1  ;;  %v210_v3 = vld [vmem:[%s753_s1] sm:$0xf]  ;;  %vm221_vm1 = vcmask 31744   ;;  %v270_v12 = vmul.f32 %v209_v1, %v209_v1  ;;  %s417_s24 = sshll.u32 %s588_s15, 3 }
  0x22   : > { %214 = vperm.xlu0 %481, %v211_v2   ;;  %s308_s5 = scalar_lea.hbm %s755_s3, %s417_s24  ;;  %s206_s6 = scalar_lea.vmem [#allocation5], %s405_s18 }
  0x23   : > { %s310_s7 = sshll.u32 %s206_s6, 4  ;;  %s312_s8 = sshll.u32 %s308_s5, 4  ;;  %s311_s7 = int_to_ptr.vmem [resolvable:$true] %s310_s7  ;;  %s313_s8 = int_to_ptr.hbm [resolvable:$true] %s312_s8 }
  0x24   : > { %s295_s15 = scalar_lea.sflag [#allocation4], %s693_s11  ;;  %s528_s9 = sshra.s32 %s313_s8, 4  ;;  %s529_s9 = int_to_ptr.hbm [resolvable:$true] %s528_s9 }
  0x25   : > { %s530_s10 = scalar_lea.hbm %s529_s9, 8  ;;  %s534_s21 = scalar_lea.hbm %s755_s3, 16 }
  0x26   : > { %p531_p4 = scmp.ne.s32.totalorder %s529_s9, %s530_s10  ;;  %p535_p7 = scmp.lt.s32.totalorder %s529_s9, %s755_s3 }
  0x27   : > { %p536_p8 = scmp.lt.s32.totalorder %s534_s21, %s530_s10 }
  0x28   : > { %v219_v4 = vld.sshfl [vmem:[#allocation1] sm:$0xff pattern:$0x75316420]  ;;  %v220_v5 = vld.sshfl [vmem:[#allocation1 + $0x8] sm:$0xff pattern:$0x75316420]  ;;  %p532_p5 = pnand %p531_p4, %p670_p9 }
  0x29   : > { %407 = vmatpush.msk.msra.mxu0 %vm225_vm0, %v219_v4  ;;  %409 = vmatpush.msk.msra.mxu1 %vm225_vm0, %v220_v5  ;;  %p537_p10 = por %p536_p8, %p535_p7 }
  0x2a   : > { %408 = vmatmul.msk.f32.vlgmr.msra.gmra.mxu0 %vm221_vm1, %v210_v3  ;;  %410 = vmatmul.msk.f32.vlgmr.msra.gmra.mxu1 %vm221_vm1, %v210_v3  ;;  %p533_p6 = pneg %p532_p5 }
  0x2c   : > { %p538_p13 = pnand %p537_p10, %p533_p6 }
  0x94   : > { %v215_v6 = vpop.permute.xlu0 %214 }
  0xa7   : > { %v247_v7 = vpop.f32.mrf.mxu0  ;;  %v267_v8 = vpop.f32.mrf.mxu1 }
  0xa8   : > { %v248_v9 = vadd.f32 %v247_v7, %v215_v6  ;;  %v268_v10 = vadd.f32 %v267_v8, %v215_v6 }
  0xaa   : > { %v272_v11 = vmul.f32 %v268_v10, %v268_v10  ;;  %v271_v13 = vmul.f32 %v248_v9, %v248_v9 }
  0xac   : > { %v275_v14 = vrot.slane %v272_v11, 4 }
  0xae   : > { %v276_v15 = vsel %vm225_vm0, %v271_v13, %v275_v14 }
  0xaf   : > { %v278_v16 = vadd.f32 %v276_v15, %v270_v12 }
  0xb1   : > { %v279_v17 = vmul.f32 0.5, %v278_v16 }
  0xb3   : > { %v280_v18 = vadd.f32 1e-06, %v279_v17 }
  0xb5   : > { %482 = vrsqrt.f32 %v280_v18  ;;  %vm288_vm2 = vcmp.eq.f32.partialorder %v280_v18, inf  ;;  %v291_v26 = vand.u32 2147483648, %v280_v18  ;;  %vm290_vm3 = vcmp.eq.f32.partialorder %v280_v18, 0.0 }
  0xbb   : > { %v483_v19 = vpop.eup %482 }
  0xbc   : > { %v282_v20 = vmul.f32 %v483_v19, %v280_v18 }
  0xbe   : > { %v283_v21 = vmul.f32 %v483_v19, %v282_v20 }
  0xc0   : > { %v284_v22 = vmul.f32 0.5, %v283_v21 }
  0xc2   : > { %v285_v23 = vsub.f32 1.5, %v284_v22 }
  0xc4   : > { %v286_v24 = vmul.f32 %v483_v19, %v285_v23 }
  0xc6   : > { %v287_v25 = vmul.f32 %v286_v24, %v280_v18 }
  0xc8   : > { %v289_v27 = vsel %vm288_vm2, %v280_v18, %v287_v25 }
  0xc9   : > { %v292_v28 = vsel %vm290_vm3, %v291_v26, %v289_v27 }
  0xca   : > { %293 = vst [vmem:[%s206_s6] sm:$0xff] %v292_v28 }
  0xcb   : > { %541 = shalt.err (!%p538_p13)
}
  0xcc   : > { %420 = dma.vmem_to_hbm [thread:$0]  (%p670_p9), %s311_s7, 128, %s313_s8, %s295_s15  }
  0xcd PF: > { %s324_s11 = sand.u32 1, %s576_s12   ;;  %p427_p0 = pnand %p400_p12, %p677_p11 }
  0xce   : > { %s325_s28 = scalar_lea.sflag [#allocation4], %s324_s11 }
  0xcf   : > { %p428_p1 = pneg %p427_p0 }
  0xd1   : > { %571 = dma.done.wait (%p428_p1), %s325_s28, 128  }
  0xd2   : > { %573 = vsyncadd (%p428_p1), %s325_s28, 4294967168  ;;  %s19_s17 = sadd.s32 1, %s596_s17   ;;  %s760_s12 = smov %s580_s13 }
  0xd3   : > { %p16_p2 = scmp.ge.s32.totalorder %s19_s17, 4   ;;  %s761_s13 = smov %s584_s14 }
  0xd4   : > { %s762_s14 = smov %s675_s26  ;;  %s763_s15 = smov %s592_s16 }
  0xd5   : > { %s764_s16 = smov %s766_s20  ;;  %18 = sbr.rel (!%p16_p2) target bundleno = 6 (0x6), region = 77 }
  0xda   :  { %331 = vsyncpa [#allocation3], 1 }
  0xdb   :  { %333 = vsyncpa [#allocation3 + $0x1], 1 }
  0xdc   :  { %334 = vsyncpa [#allocation4], 1 }
  0xdd   :  { %336 = vsyncpa [#allocation4 + $0x1], 1 }

</bundles_post_ra>
